<compile_context>
chip_gen: v7x
topology: tpu7x:2x2x1
jax: 0.10.0
libtpu: 0.0.40
codegen_flags: <defaults>
</compile_context>

<pallas_src>
import functools
import math

import jax
import jax.numpy as jnp
from jax.experimental import pallas as pl
from jax.experimental.pallas import tpu as pltpu


# ----------------------------------------------------------------------------
# Tile-size helpers (tiles must divide the dim and respect the (8,128) rule,
# falling back to the full dim for small/odd shapes).
# ----------------------------------------------------------------------------
def _pick_tile(dim, target, align):
    if dim <= target:
        return dim
    t = (target // align) * align
    while t >= align:
        if dim % t == 0:
            return t
        t -= align
    return dim


def _pick_heads_per_block(n_head, head_dim):
    # smallest head-group so the batched matmul has >= 256 "rows" of MXU work
    for hb in range(1, n_head + 1):
        if n_head % hb == 0 and hb * head_dim >= 256:
            return hb
    return n_head


def _pick_q_tile(L, Lk, hb, E, Ev, itemsize, out_weights, budget_bytes=12 * (1 << 20)):
    """Largest query tile (multiple of 8, dividing L) whose per-step VMEM fits."""
    kv_bytes = 2 * hb * Lk * (E + Ev) * itemsize            # double-buffered K + V

    def step_bytes(tq):
        io = 2 * hb * tq * (E + Ev) * itemsize              # double-buffered Q + O
        if out_weights:
            io += 2 * hb * tq * Lk * itemsize               # attention-weights out
        tmp = 3 * hb * tq * Lk * 4                          # f32 scores / exp / probs
        return kv_bytes + io + tmp

    cands = sorted({d for d in range(8, L + 1, 8) if L % d == 0} | {L}, reverse=True)
    for tq in cands:
        if tq <= 512 and step_bytes(tq) <= budget_bytes:
            return tq
    return min(cands)


# ----------------------------------------------------------------------------
# Tiled linear kernel:  y = x @ W + b   (W stored (d_in, d_out))
# ----------------------------------------------------------------------------
def _linear_kernel(x_ref, w_ref, b_ref, o_ref, acc_ref):
    kk = pl.program_id(2)

    @pl.when(kk == 0)
    def _():
        acc_ref[...] = jnp.zeros_like(acc_ref)

    acc_ref[...] += jnp.dot(
        x_ref[...].astype(jnp.bfloat16),
        w_ref[...].astype(jnp.bfloat16),
        preferred_element_type=jnp.float32,
    )

    @pl.when(kk == pl.num_programs(2) - 1)
    def _():
        o_ref[...] = (acc_ref[...] + b_ref[...].astype(jnp.float32)).astype(o_ref.dtype)


def linear_pallas(x2d, w, b):
    m, d_in = x2d.shape
    d_out = w.shape[1]
    tm = _pick_tile(m, 256, 8)
    tn = _pick_tile(d_out, 256, 128)
    tk = _pick_tile(d_in, 512, 128)
    grid = (m // tm, d_out // tn, d_in // tk)
    return pl.pallas_call(
        _linear_kernel,
        out_shape=jax.ShapeDtypeStruct((m, d_out), x2d.dtype),
        grid=grid,
        in_specs=[
            pl.BlockSpec((tm, tk), lambda i, j, kk: (i, kk)),
            pl.BlockSpec((tk, tn), lambda i, j, kk: (kk, j)),
            pl.BlockSpec((1, tn), lambda i, j, kk: (0, j)),
        ],
        out_specs=pl.BlockSpec((tm, tn), lambda i, j, kk: (i, j)),
        scratch_shapes=[pltpu.VMEM((tm, tn), jnp.float32)],
        compiler_params=pltpu.CompilerParams(
            dimension_semantics=("parallel", "parallel", "arbitrary")),
    )(x2d, w, b.reshape(1, d_out))


# ----------------------------------------------------------------------------
# Scaled dot-product attention kernel (mask=False path of Attention.forward).
# One grid point per (batch, head-group, query-tile); heads batched per step.
# ----------------------------------------------------------------------------
def _attention_kernel(q_ref, k_ref, v_ref, o_ref, w_ref=None, *, scale):
    # Fold the 1/sqrt(E) scale into q (O(L*E) instead of O(L*Lk)); keep f32 math
    # for the scale/softmax, bf16 only on the MXU operands (v5e-safe: no bf16 VPU).
    q = (q_ref[...].astype(jnp.float32) * scale).astype(jnp.bfloat16)   # (hb, tq, E)
    k = k_ref[...].astype(jnp.bfloat16)                                 # (hb, Lk, E)
    v = v_ref[...].astype(jnp.bfloat16)                                 # (hb, Lk, Ev)

    s = jnp.einsum("hqd,hkd->hqk", q, k,
                   preferred_element_type=jnp.float32)                  # (hb, tq, Lk)
    m = jnp.max(s, axis=-1, keepdims=True)
    e = jnp.exp(s - m)
    denom = jnp.sum(e, axis=-1, keepdims=True)
    p = e * pl.reciprocal(denom, approx=True)                           # softmax (f32)

    if w_ref is not None:
        w_ref[...] = p.astype(w_ref.dtype)

    o = jnp.einsum("hqk,hkd->hqd", p.astype(jnp.bfloat16), v,
                   preferred_element_type=jnp.float32)                  # (hb, tq, Ev)
    o_ref[...] = o.astype(o_ref.dtype)


def attention_pallas(q, k, v, scale, output_attention=True):
    # q: (B, H, L, E), k: (B, H, Lk, E), v: (B, H, Lk, Ev)
    B, H, L, E = q.shape
    _, _, Lk, Ev = v.shape

    hb = _pick_heads_per_block(H, E)
    tq = _pick_q_tile(L, Lk, hb, E, Ev, q.dtype.itemsize, output_attention)
    grid = (B, H // hb, L // tq)

    kernel = functools.partial(_attention_kernel, scale=scale)

    in_specs = [
        pl.BlockSpec((None, hb, tq, E), lambda b, hg, qi: (b, hg, qi, 0)),
        pl.BlockSpec((None, hb, Lk, E), lambda b, hg, qi: (b, hg, 0, 0)),
        pl.BlockSpec((None, hb, Lk, Ev), lambda b, hg, qi: (b, hg, 0, 0)),
    ]
    o_spec = pl.BlockSpec((None, hb, tq, Ev), lambda b, hg, qi: (b, hg, qi, 0))
    o_shape = jax.ShapeDtypeStruct((B, H, L, Ev), q.dtype)

    if output_attention:
        out_shape = (o_shape, jax.ShapeDtypeStruct((B, H, L, Lk), q.dtype))
        out_specs = (o_spec,
                     pl.BlockSpec((None, hb, tq, Lk), lambda b, hg, qi: (b, hg, qi, 0)))
    else:
        out_shape = o_shape
        out_specs = o_spec

    res = pl.pallas_call(
        kernel,
        out_shape=out_shape,
        grid=grid,
        in_specs=in_specs,
        out_specs=out_specs,
        compiler_params=pltpu.CompilerParams(
            dimension_semantics=("parallel", "parallel", "parallel")),
    )(q, k, v)

    if output_attention:
        return res
    return res, None


# ----------------------------------------------------------------------------
# MultiHead_Attention forward (mask=False, output_attention=True)
# ----------------------------------------------------------------------------
def init_params(key, d_model, n_head, d_key, d_value):
    ks = jax.random.split(key, 6)
    s = 1.0 / math.sqrt(d_model)
    p = {
        "wq": jax.random.uniform(ks[0], (d_model, n_head * d_key), jnp.float32, -s, s),
        "bq": jax.random.uniform(ks[1], (n_head * d_key,), jnp.float32, -s, s),
        "wk": jax.random.uniform(ks[2], (d_model, n_head * d_key), jnp.float32, -s, s),
        "bk": jax.random.uniform(ks[3], (n_head * d_key,), jnp.float32, -s, s),
        "wv": jax.random.uniform(ks[4], (d_model, n_head * d_value), jnp.float32, -s, s),
        "bv": jax.random.uniform(ks[5], (n_head * d_value,), jnp.float32, -s, s),
    }
    # Pre-built fused QKV weight for the self-attention path (built once here,
    # not per forward call).
    p["wqkv"] = jnp.concatenate([p["wq"], p["wk"], p["wv"]], axis=1)
    p["bqkv"] = jnp.concatenate([p["bq"], p["bk"], p["bv"]])
    return p


def multi_head_attention(params, queries, keys, values, n_head, output_attention=True):
    B, L, d = queries.shape
    _, L_k, _ = keys.shape

    if queries is keys and keys is values:
        # Self-attention: single fused QKV GEMM (activation read once, wide N).
        qkv = linear_pallas(queries.reshape(B * L, d), params["wqkv"], params["bqkv"])
        dq = params["wq"].shape[1]
        q = qkv[:, :dq]
        k = qkv[:, dq:2 * dq]
        v = qkv[:, 2 * dq:]
    else:
        q = linear_pallas(queries.reshape(B * L, d), params["wq"], params["bq"])
        k = linear_pallas(keys.reshape(B * L_k, d), params["wk"], params["bk"])
        v = linear_pallas(values.reshape(B * L_k, d), params["wv"], params["bv"])

    q = q.reshape(B, L, n_head, -1).transpose(0, 2, 1, 3)    # (B, H, L,  E)
    k = k.reshape(B, L_k, n_head, -1).transpose(0, 2, 1, 3)  # (B, H, Lk, E)
    v = v.reshape(B, L_k, n_head, -1).transpose(0, 2, 1, 3)  # (B, H, Lk, Ev)

    d_key = q.shape[-1]
    scale = 1.0 / math.sqrt(d_key)

    attn_out, attn_weights = attention_pallas(q, k, v, scale,
                                              output_attention=output_attention)

    # (B, H, L, Ev) -> (B, L, H, Ev) -> (B, L, H*Ev)
    out = attn_out.transpose(0, 2, 1, 3).reshape(B, L, -1)
    return out, attn_weights


# ----------------------------------------------------------------------------
# Plain-JAX reference for verification
# ----------------------------------------------------------------------------
def reference(params, queries, keys, values, n_head):
    B, L, d = queries.shape
    _, L_k, _ = keys.shape
    q = (queries @ params["wq"] + params["bq"]).reshape(B, L, n_head, -1)
    k = (keys @ params["wk"] + params["bk"]).reshape(B, L_k, n_head, -1)
    v = (values @ params["wv"] + params["bv"]).reshape(B, L_k, n_head, -1)
    qh = q.transpose(0, 2, 1, 3)
    kh = k.transpose(0, 2, 1, 3)
    vh = v.transpose(0, 2, 1, 3)
    scale = 1.0 / math.sqrt(qh.shape[-1])
    scores = jnp.einsum("bhld,bhkd->bhlk", qh, kh) * scale
    p = jax.nn.softmax(scores, axis=-1)
    out = jnp.einsum("bhlk,bhkd->bhld", p, vh)
    return out.transpose(0, 2, 1, 3).reshape(B, L, -1), p


if __name__ == "__main__":
    B, L, L_k, d_model = 2, 8, 16, 32
    n_head, d_key, d_value = 4, 8, 8

    root = jax.random.PRNGKey(0)
    k_params, k_q, k_k, k_v, k_x = jax.random.split(root, 5)
    params = init_params(k_params, d_model, n_head, d_key, d_value)

    # --- self-attention (fused QKV projection path) ---
    x = jax.random.normal(k_x, (B, L, d_model), jnp.float32)
    out_s, attn_s = multi_head_attention(params, x, x, x, n_head)
    jax.block_until_ready((out_s, attn_s))
    ref_out_s, ref_attn_s = reference(params, x, x, x, n_head)
    assert out_s.shape == (B, L, n_head * d_value)
    assert attn_s.shape == (B, n_head, L, L)
    assert jnp.allclose(out_s, ref_out_s, atol=3e-2, rtol=3e-2)
    assert jnp.allclose(attn_s, ref_attn_s, atol=3e-2, rtol=3e-2)

    # --- cross-attention (separate projections, L_k != L) ---
    queries = jax.random.normal(k_q, (B, L, d_model), jnp.float32)
    keys = jax.random.normal(k_k, (B, L_k, d_model), jnp.float32)
    values = jax.random.normal(k_v, (B, L_k, d_model), jnp.float32)
    out_c, attn_c = multi_head_attention(params, queries, keys, values, n_head)
    jax.block_until_ready((out_c, attn_c))
    ref_out_c, ref_attn_c = reference(params, queries, keys, values, n_head)
    assert out_c.shape == (B, L, n_head * d_value)
    assert attn_c.shape == (B, n_head, L, L_k)
    assert jnp.allclose(out_c, ref_out_c, atol=3e-2, rtol=3e-2)
    assert jnp.allclose(attn_c, ref_attn_c, atol=3e-2, rtol=3e-2)

    # --- output_attention=False path (no weights writeback) ---
    out_n, w_n = multi_head_attention(params, x, x, x, n_head, output_attention=False)
    jax.block_until_ready(out_n)
    assert w_n is None
    assert jnp.allclose(out_n, ref_out_s, atol=3e-2, rtol=3e-2)

    print("KERNEL_OK")
</pallas_src>

<mosaic_0001>
module attributes {stable_mosaic.version = 11 : i64} {
  func.func @_linear_kernel(%arg0: i32, %arg1: i32, %arg2: i32, %arg3: memref<16x32xf32, #tpu.memory_space<vmem>>, %arg4: memref<32x96xf32, #tpu.memory_space<vmem>>, %arg5: memref<1x96xf32, #tpu.memory_space<vmem>>, %arg6: memref<16x96xf32, #tpu.memory_space<vmem>>, %arg7: memref<16x96xf32, #tpu.memory_space<vmem>>) attributes {dimension_semantics = [#tpu.dimension_semantics<parallel>, #tpu.dimension_semantics<parallel>, #tpu.dimension_semantics<arbitrary>], iteration_bounds = array<i64: 1, 1, 1>, scalar_prefetch = 0 : i64, scratch_operands = 1 : i64, tpu.core_type = #tpu.core_type<tc>, window_params = [{transform_indices = @transform_0, window_bounds = array<i64: 16, 32>}, {transform_indices = @transform_1, window_bounds = array<i64: 32, 96>}, {transform_indices = @transform_2, window_bounds = array<i64: 1, 96>}, {transform_indices = @transform_3, window_bounds = array<i64: 16, 96>}]} {
    %c0_i32 = arith.constant 0 : i32
    %0 = arith.cmpi eq, %arg2, %c0_i32 : i32
    %1 = arith.extui %0 : i1 to i32
    %c0_i32_0 = arith.constant 0 : i32
    %2 = arith.cmpi ne, %1, %c0_i32_0 : i32
    scf.if %2 {
      %cst_10 = arith.constant 0.000000e+00 : f32
      %14 = vector.broadcast %cst_10 : f32 to vector<16x96xf32>
      %c0_11 = arith.constant 0 : index
      %c0_12 = arith.constant 0 : index
      %15 = vector.load %arg7[%c0_11, %c0_12] : memref<16x96xf32, #tpu.memory_space<vmem>>, vector<16x96xf32>
      tpu.vector_store %arg7[%c0_11, %c0_12], %14 {strides = array<i32>} : memref<16x96xf32, #tpu.memory_space<vmem>>, vector<16x96xf32>,
    } else {
    }
    %c0 = arith.constant 0 : index
    %c0_1 = arith.constant 0 : index
    %3 = vector.load %arg7[%c0, %c0_1] : memref<16x96xf32, #tpu.memory_space<vmem>>, vector<16x96xf32>
    %c0_2 = arith.constant 0 : index
    %c0_3 = arith.constant 0 : index
    %4 = vector.load %arg3[%c0_2, %c0_3] : memref<16x32xf32, #tpu.memory_space<vmem>>, vector<16x32xf32>
    %5 = arith.truncf %4 : vector<16x32xf32> to vector<16x32xbf16>
    %c0_4 = arith.constant 0 : index
    %c0_5 = arith.constant 0 : index
    %6 = vector.load %arg4[%c0_4, %c0_5] : memref<32x96xf32, #tpu.memory_space<vmem>>, vector<32x96xf32>
    %7 = arith.truncf %6 : vector<32x96xf32> to vector<32x96xbf16>
    %cst = arith.constant dense<0.000000e+00> : vector<16x96xf32>
    %8 = tpu.matmul %5, %7, %cst {dimension_numbers = #tpu.dot_dimension_numbers<[1], [0], [0], [1], [0, 0, 1, 1], [], []>} : vector<16x32xbf16>, vector<32x96xbf16>, vector<16x96xf32> -> vector<16x96xf32>
    %9 = arith.addf %3, %8 : vector<16x96xf32>
    %c0_6 = arith.constant 0 : index
    %c0_7 = arith.constant 0 : index
    %10 = vector.load %arg7[%c0_6, %c0_7] : memref<16x96xf32, #tpu.memory_space<vmem>>, vector<16x96xf32>
    tpu.vector_store %arg7[%c0_6, %c0_7], %9 {strides = array<i32>} : memref<16x96xf32, #tpu.memory_space<vmem>>, vector<16x96xf32>,
    %c0_i32_8 = arith.constant 0 : i32
    %11 = arith.cmpi eq, %arg2, %c0_i32_8 : i32
    %12 = arith.extui %11 : i1 to i32
    %c0_i32_9 = arith.constant 0 : i32
    %13 = arith.cmpi ne, %12, %c0_i32_9 : i32
    scf.if %13 {
      %c0_10 = arith.constant 0 : index
      %c0_11 = arith.constant 0 : index
      %14 = vector.load %arg7[%c0_10, %c0_11] : memref<16x96xf32, #tpu.memory_space<vmem>>, vector<16x96xf32>
      %c0_12 = arith.constant 0 : index
      %c0_13 = arith.constant 0 : index
      %15 = vector.load %arg5[%c0_12, %c0_13] : memref<1x96xf32, #tpu.memory_space<vmem>>, vector<1x96xf32>
      %16 = vector.broadcast %15 : vector<1x96xf32> to vector<16x96xf32>
      %17 = arith.addf %14, %16 : vector<16x96xf32>
      %c0_14 = arith.constant 0 : index
      %c0_15 = arith.constant 0 : index
      %18 = vector.load %arg6[%c0_14, %c0_15] : memref<16x96xf32, #tpu.memory_space<vmem>>, vector<16x96xf32>
      tpu.vector_store %arg6[%c0_14, %c0_15], %17 {strides = array<i32>} : memref<16x96xf32, #tpu.memory_space<vmem>>, vector<16x96xf32>,
    } else {
    }
    return
  }
  func.func @transform_0(%arg0: i32, %arg1: i32, %arg2: i32) -> (i32, i32) {
    %c0_i32 = arith.constant 0 : i32
    return %arg0, %arg2 : i32, i32
  }
  func.func @transform_1(%arg0: i32, %arg1: i32, %arg2: i32) -> (i32, i32) {
    %c0_i32 = arith.constant 0 : i32
    return %arg2, %arg1 : i32, i32
  }
  func.func @transform_2(%arg0: i32, %arg1: i32, %arg2: i32) -> (i32, i32) {
    %c0_i32 = arith.constant 0 : i32
    %c0_i32_0 = arith.constant 0 : i32
    return %c0_i32, %arg1 : i32, i32
  }
  func.func @transform_3(%arg0: i32, %arg1: i32, %arg2: i32) -> (i32, i32) {
    %c0_i32 = arith.constant 0 : i32
    return %arg0, %arg1 : i32, i32
  }
}

</mosaic_0001>

<bundles_post_ra>
// kernel: tpu_custom_call.1
= control target key start
LH: loop header
LB: loop body
LE: loop exit
PB: predicated region body
PF: predicated region fallthrough
CT: control target
= control target key end

     0   :  { %8 = vsyncpa [#allocation4], 0  ;;  %s319_s0 = inlined_call_operand.hbm [shape: f32[16,32], index: 0, kind: input, shape index: {}]   ;;  %s320_s1 = inlined_call_operand.hbm [shape: f32[32,96], index: 1, kind: input, shape index: {}]   ;;  %s321_s2 = inlined_call_operand.vmem [shape: f32[1,96], index: 2, kind: input, shape index: {}]   ;;  %s322_s3 = inlined_call_operand.hbm [shape: f32[16,96], index: 3, kind: output, shape index: {}]  }
   0x1   :  { %9 = vsyncpa [#allocation7], 0 }
   0x2   :  { %10 = vsyncpa [#allocation5], 0  ;;  %s238_s12 = smov [#allocation3]   ;;  %s166_s16 = scalar_lea.hbm %s319_s0, 256 }
   0x3   :  { %s16_s13 = sshll.u32 %s238_s12, 4  ;;  %p167_p0 = scmp.ne.s32.totalorder %s319_s0, %s166_s16  ;;  %s17_s13 = int_to_ptr.vmem [resolvable:$true] %s16_s13 }
   0x4   :  { %p170_p1 = scmp.lt.u32.totalorder %s166_s16, %s319_s0 }
   0x6   :  { %p172_p2 = pnand %p170_p1, %p167_p0 }
   0x8   :  { %175 = shalt.err (!%p172_p2)
}
   0x9   :  { %s176_s21 = scalar_lea.vmem %s17_s13, 256  ;;  %p181_p4 = scmp.lt.s32.totalorder %s17_s13, %s17_s13 }
   0xa   :  { %p177_p3 = scmp.ne.s32.totalorder %s17_s13, %s176_s21  ;;  %p182_p5 = scmp.lt.s32.totalorder %s176_s21, %s176_s21 }
   0xc   :  { %p183_p6 = por %p182_p5, %p181_p4 }
   0xe   :  { %p184_p7 = pnand %p183_p6, %p177_p3 }
  0x10   :  { %187 = shalt.err (!%p184_p7)
}
  0x11   :  { %s239_s22 = smov 128   ;;  %s240_s23 = smov 8  }
  0x12   :  { %22 = dma.hbm_to_vmem [thread:$0]  %s319_s0, 256, %s17_s13, [#allocation4], %s239_s22, %s239_s22, %s240_s23  }
  0x13   :  { %s241_s26 = smov [#allocation6]   ;;  %s188_s30 = scalar_lea.hbm %s320_s1, 512 }
  0x14   :  { %s28_s27 = sshll.u32 %s241_s26, 4  ;;  %p189_p8 = scmp.ne.s32.totalorder %s320_s1, %s188_s30  ;;  %s29_s27 = int_to_ptr.vmem [resolvable:$true] %s28_s27 }
  0x15   :  { %p192_p9 = scmp.lt.u32.totalorder %s188_s30, %s320_s1 }
  0x17   :  { %p194_p10 = pnand %p192_p9, %p189_p8 }
  0x19   :  { %197 = shalt.err (!%p194_p10)
}
  0x1a   :  { %s198_s8 = scalar_lea.vmem %s29_s27, 512  ;;  %p203_p12 = scmp.lt.s32.totalorder %s29_s27, %s29_s27 }
  0x1b   :  { %p199_p11 = scmp.ne.s32.totalorder %s29_s27, %s198_s8  ;;  %p204_p13 = scmp.lt.s32.totalorder %s198_s8, %s198_s8 }
  0x1d   :  { %p205_p0 = por %p204_p13, %p203_p12 }
  0x1f   :  { %p206_p1 = pnand %p205_p0, %p199_p11 }
  0x21   :  { %209 = shalt.err (!%p206_p1)
}
  0x22   :  { %34 = dma.hbm_to_vmem [thread:$0]  %s320_s1, 512, %s29_s27, [#allocation7], %s239_s22, %s239_s22, %s240_s23  }
  0x23   :  { %232 = dma.done.wait [#allocation4], 256  }
  0x24   :  { %233 = vsyncadd [#allocation4], 4294967040 }
  0x25   :  { %234 = dma.done.wait [#allocation7], 512  }
  0x26   :  { %235 = vsyncadd [#allocation7], 4294966784  ;;  %vm48_vm0 = vcmask 785408   ;;  %v242_v0 = vmov 0.0   ;;  %vm243_vm1 = vmmov 0   ;;  %v56_v1 = vld [vmem:[#allocation6] sm:$0xff] }
  0x27   :  { %49 = vst.msk [vmem:[#allocation2] sm:$0xff] %vm48_vm0, %v242_v0  ;;  %50 = vst.msk [vmem:[#allocation2 + $0x8] sm:$0xff] %vm48_vm0, %v242_v0  ;;  %151 = vmatprep.subr.bf16.mxu0 %v242_v0  ;;  %155 = vmatprep.mubr.msk.bf16.mxu0 %vm243_vm1, %v242_v0  ;;  %v57_v2 = vld [vmem:[#allocation6 + $0x8] sm:$0xff]  ;;  %v58_v3 = vld [vmem:[#allocation6 + $0x10] sm:$0xff]  ;;  %vm62_vm2 = vcmask 261120   ;;  %s244_s11 = smov [#allocation8]  }
  0x28   :  { %v60_v4 = vpack.c.bf16 %v57_v2, %v56_v1  ;;  %v59_v5 = vld [vmem:[#allocation6 + $0x18] sm:$0xff]  ;;  %v53_v7 = vld [vmem:[#allocation3] sm:$0xff]  ;;  %v147_v18 = vld [vmem:[%s321_s2] ss:$0 sm:$0xff]  ;;  %s133_s12 = sshll.u32 %s244_s11, 4  ;;  %s134_s12 = int_to_ptr.vmem [resolvable:$true] %s133_s12 }
  0x29   :  { %v61_v6 = vpack.c.bf16 %v59_v5, %v58_v3  ;;  %v54_v8 = vld [vmem:[#allocation3 + $0x8] sm:$0xff]  ;;  %s210_s13 = scalar_lea.vmem %s134_s12, 256  ;;  %p215_p3 = scmp.lt.s32.totalorder %s134_s12, %s134_s12 }
  0x2a   :  { %152 = vmatpush3.bf16.msra.mxu0 %v60_v4  ;;  %v55_v9 = vpack.c.bf16 %v54_v8, %v53_v7  ;;  %p211_p2 = scmp.ne.s32.totalorder %s134_s12, %s210_s13  ;;  %p216_p4 = scmp.lt.s32.totalorder %s210_s13, %s210_s13 }
  0x2b   :  { %153 = vmatprep.subr.bf16.mxu0 %v242_v0 }
  0x2c   :  { %p217_p5 = por %p216_p4, %p215_p3 }
  0x2e   :  { %154 = vmatpush3.bf16.msra.mxu0 %v61_v6  ;;  %v51_v10 = vld [vmem:[#allocation2] sm:$0xff]  ;;  %v52_v12 = vld [vmem:[#allocation2 + $0x8] sm:$0xff]  ;;  %p218_p6 = pnand %p217_p5, %p211_p2 }
  0x31   :  { %156 = vmatmul.mubr.msk.bf16.vlgmr.msra.gmra.mrb[0].mxu0 %vm62_vm2, %v55_v9 }
 0x104   :  { %v100_v11 = vpop.f32.mrb[0].mxu0 }
 0x105   :  { %v107_v13 = vadd.f32 %v100_v11, %v51_v10  ;;  %v157_v14 = vpop.f32.mrb[1].mxu0 }
 0x106   :  { %v103_v15 = vpop.f32.mrb[2].mxu0 }
 0x107   :  { %110 = vst.msk [vmem:[#allocation2] sm:$0xff] %vm48_vm0, %v107_v13  ;;  %v108_v16 = vadd.f32 %v103_v15, %v52_v12  ;;  %v158_v17 = vpop.f32.mrb[3].mxu0 }
 0x109   :  { %111 = vst.msk [vmem:[#allocation2 + $0x8] sm:$0xff] %vm48_vm0, %v108_v16 }
 0x10e   :  { %v115_v19 = vld [vmem:[#allocation2] sm:$0xff] }
 0x10f   :  { %v124_v20 = vadd.f32 %v147_v18, %v115_v19 }
 0x110   :  { %v116_v21 = vld [vmem:[#allocation2 + $0x8] sm:$0xff] }
 0x111   :  { %v125_v22 = vadd.f32 %v147_v18, %v116_v21  ;;  %126 = vst.msk [vmem:[#allocation8] sm:$0xff] %vm48_vm0, %v124_v20 }
 0x113   :  { %127 = vst.msk [vmem:[#allocation8 + $0x8] sm:$0xff] %vm48_vm0, %v125_v22 }
 0x114   :  { %221 = shalt.err (!%p218_p6)
}
 0x115   :  { %s222_s15 = scalar_lea.hbm %s322_s3, 256 }
 0x116   :  { %p223_p7 = scmp.ne.s32.totalorder %s322_s3, %s222_s15  ;;  %p226_p8 = scmp.lt.u32.totalorder %s222_s15, %s322_s3 }
 0x118   :  { %p228_p9 = pnand %p226_p8, %p223_p7 }
 0x11a   :  { %231 = shalt.err (!%p228_p9)
}
 0x11b   :  { %139 = dma.vmem_to_hbm [thread:$0]  %s134_s12, 256, %s322_s3, [#allocation5], %s239_s22, %s239_s22, %s240_s23  }
 0x11c   :  { %236 = dma.done.wait [#allocation5], 256  }
 0x11d   :  { %237 = vsyncadd [#allocation5], 4294967040 }
 0x11e   :  { %143 = vsyncpa [#allocation4], 1 }
 0x11f   :  { %144 = vsyncpa [#allocation7], 1 }
 0x120   :  { %145 = vsyncpa [#allocation5], 1 }

</bundles_post_ra>
